<compile_context>
chip_gen: v7x
topology: tpu7x:2x2x1
jax: 0.10.0
libtpu: 0.0.40
codegen_flags: <defaults>
</compile_context>

<pallas_src>
import functools

import jax
import jax.numpy as jnp
import numpy as np
from jax.experimental import pallas as pl
from jax.experimental.pallas import tpu as pltpu


def _round_up(x: int, m: int) -> int:
    return (x + m - 1) // m * m


def _lse_kernel(emb_ref, lse_ref):
    """One-shot: per-row logsumexp of the (V, V) embedding table -> (V, 1)."""
    tbl = emb_ref[...].astype(jnp.float32)
    m = jnp.max(tbl, axis=-1, keepdims=True)
    lse_ref[...] = m + jnp.log(jnp.sum(jnp.exp(tbl - m), axis=-1, keepdims=True))


def _bigram_kernel(tok_ref, emb_ref, lse_ref, logits_ref, loss_ref, *,
                   tn, vocab, total_n):
    i = pl.program_id(0)

    tok = tok_ref[...]                                   # (tn, 2) int32
    idx = tok[:, 0:1]                                    # (tn, 1) token ids
    tgt = tok[:, 1:2]                                    # (tn, 1) targets

    col = jax.lax.broadcasted_iota(jnp.int32, (tn, vocab), 1)   # lane ids
    idx_hit = col == idx                                 # (tn, V)

    # Embedding gather as one-hot @ table on the (otherwise idle) MXU; exact f32.
    onehot = idx_hit.astype(jnp.float32)
    logits = jnp.dot(onehot, emb_ref[...], preferred_element_type=jnp.float32)
    logits_ref[...] = logits.astype(logits_ref.dtype)

    # Per-token cross entropy: lse_table[idx] - logits[target].
    # No (tn, V) one-hot temp for the target; a single lane-reduce per step and
    # no cross-step scalar accumulator (keeps the grid axis parallel-safe).
    lse_row = lse_ref[...]                               # (1, V) f32, lane-dense
    terms = (jnp.where(idx_hit, lse_row, 0.0)
             - jnp.where(col == tgt, logits, 0.0))       # (tn, V)
    loss_vec = jnp.sum(terms, axis=-1, keepdims=True)    # (tn, 1)

    # Mask rows added when padding the token stream up to a tile multiple.
    row = i * tn + jax.lax.broadcasted_iota(jnp.int32, (tn, 1), 0)
    loss_ref[...] = jnp.where(row < total_n, loss_vec, 0.0)


def bigram_forward(idx, targets, emb_table, *, tn=512, logits_dtype=jnp.float32):
    """Forward pass of BingramLanguangeModel: returns (logits (B,T,V), loss)."""
    B, T = idx.shape
    V = emb_table.shape[0]
    N = B * T

    # Large tiles (multiple of 8 sublanes); clamp for tiny inputs, pad N up.
    tn_eff = _round_up(max(8, min(tn, _round_up(N, 8))), 8)
    n_pad = _round_up(N, tn_eff)
    grid = n_pad // tn_eff

    idx_flat = idx.reshape(N).astype(jnp.int32)
    if targets is None:
        tgt_flat = jnp.zeros((N,), jnp.int32)
    else:
        tgt_flat = targets.reshape(N).astype(jnp.int32)
    pad = n_pad - N
    if pad:
        idx_flat = jnp.pad(idx_flat, (0, pad))
        tgt_flat = jnp.pad(tgt_flat, (0, pad))
    # Single stacked token stream -> one small DMA per grid step instead of two.
    tok = jnp.stack([idx_flat, tgt_flat], axis=1)        # (n_pad, 2) int32

    emb_f32 = emb_table.astype(jnp.float32)

    # Hoisted logsumexp precompute (independent of sequence length).
    lse_col = pl.pallas_call(
        _lse_kernel,
        out_shape=jax.ShapeDtypeStruct((V, 1), jnp.float32),
        grid_spec=pltpu.PrefetchScalarGridSpec(
            num_scalar_prefetch=0,
            grid=(1,),
            in_specs=[pl.BlockSpec((V, V), lambda i: (0, 0))],
            out_specs=pl.BlockSpec((V, 1), lambda i: (0, 0)),
        ),
    )(emb_f32)
    lse_row = lse_col.reshape(1, V)   # lane-dense for in-kernel broadcast

    # VMEM budget (double-buffered pipeline buffers):
    #   2 * (tok tn*8 + table V*V*4 + lse V*4 + logits tn*V*4 + loss tn*4) bytes
    #   ~= 0.8 MiB at tn=512, V=128 -> far under the 32 MiB default scoped limit
    #   on v5e/v6e/v7x (the grid-invariant table's second buffer is 64 KiB here,
    #   i.e. negligible; it only matters for large V, see TODO above).
    kernel = functools.partial(_bigram_kernel, tn=tn_eff, vocab=V, total_n=N)

    logits_flat, loss_terms = pl.pallas_call(
        kernel,
        out_shape=(
            jax.ShapeDtypeStruct((n_pad, V), logits_dtype),
            jax.ShapeDtypeStruct((n_pad, 1), jnp.float32),
        ),
        grid_spec=pltpu.PrefetchScalarGridSpec(
            num_scalar_prefetch=0,
            grid=(grid,),
            in_specs=[
                pl.BlockSpec((tn_eff, 2), lambda i: (i, 0)),  # idx/target tile
                pl.BlockSpec((V, V), lambda i: (0, 0)),       # full table (grid-invariant)
                pl.BlockSpec((1, V), lambda i: (0, 0)),       # precomputed row LSE
            ],
            out_specs=(
                pl.BlockSpec((tn_eff, V), lambda i: (i, 0)),  # lane-dense logits tile
                pl.BlockSpec((tn_eff, 1), lambda i: (i, 0)),  # per-token loss terms
            ),
        ),
        compiler_params=pltpu.CompilerParams(
            # Each grid step owns disjoint output blocks -> shardable across
            # TensorCores on v7x; no sequential loss accumulator needed.
            dimension_semantics=("parallel",),
        ),
    )(tok, emb_f32, lse_row)

    logits = logits_flat[:N].reshape(B, T, V)
    if targets is None:
        return logits, None
    loss = jnp.sum(loss_terms) / jnp.float32(N)   # mean finished outside the kernel
    return logits, loss


def _reference_forward(idx, targets, emb_table):
    logits = emb_table[idx]                               # (B, T, V)
    B, T, V = logits.shape
    flat = logits.reshape(-1, V).astype(jnp.float32)
    t = targets.reshape(-1)
    lse = jax.scipy.special.logsumexp(flat, axis=-1)
    tgt_logit = jnp.take_along_axis(flat, t[:, None], axis=-1)[:, 0]
    return logits, jnp.mean(lse - tgt_logit)


if __name__ == "__main__":
    vocab_size = 128
    key = jax.random.PRNGKey(0)
    k_emb, k_idx, k_tgt = jax.random.split(key, 3)

    # Deterministic parameter init; padding_idx=0 -> row 0 of the table is zero.
    emb_table = jax.random.normal(k_emb, (vocab_size, vocab_size), dtype=jnp.float32)
    emb_table = emb_table.at[0].set(0.0)

    # Module-sized small case, plus a larger case exercising multi-tile grids
    # and token-stream padding.
    for (B, T) in [(2, 8), (6, 200)]:
        k_i = jax.random.fold_in(k_idx, B * 1000 + T)
        k_t = jax.random.fold_in(k_tgt, B * 1000 + T)
        idx = jax.random.randint(k_i, (B, T), 0, vocab_size, dtype=jnp.int32)
        targets = jax.random.randint(k_t, (B, T), 0, vocab_size, dtype=jnp.int32)

        logits, loss = bigram_forward(idx, targets, emb_table)
        logits = jax.block_until_ready(logits)
        loss = jax.block_until_ready(loss)

        ref_logits, ref_loss = _reference_forward(idx, targets, emb_table)
        np.testing.assert_allclose(np.asarray(logits), np.asarray(ref_logits),
                                   rtol=1e-5, atol=1e-5)
        np.testing.assert_allclose(np.asarray(loss), np.asarray(ref_loss),
                                   rtol=2e-5, atol=1e-4)

    # TODO(synk): generate() (autoregressive torch.multinomial sampling loop) is
    # host-side control flow and is not implemented as a kernel.
    print("KERNEL_OK")
</pallas_src>

<mosaic_0001>
module attributes {stable_mosaic.version = 11 : i64} {
  func.func @_lse_kernel(%arg0: i32, %arg1: memref<128x128xf32, #tpu.memory_space<vmem>>, %arg2: memref<128x1xf32, #tpu.memory_space<vmem>>) attributes {dimension_semantics = [#tpu.dimension_semantics<arbitrary>], iteration_bounds = array<i64: 1>, scalar_prefetch = 0 : i64, scratch_operands = 0 : i64, tpu.core_type = #tpu.core_type<tc>, window_params = [{pipeline_mode = #tpu.pipeline_mode<synchronous>, transform_indices = @transform_0, window_bounds = array<i64: 128, 128>}, {pipeline_mode = #tpu.pipeline_mode<synchronous>, transform_indices = @transform_1, window_bounds = array<i64: 128, 1>}]} {
    %c0 = arith.constant 0 : index
    %c0_0 = arith.constant 0 : index
    %0 = vector.load %arg1[%c0, %c0_0] : memref<128x128xf32, #tpu.memory_space<vmem>>, vector<128x128xf32>
    %cst = arith.constant dense<0xFF800000> : vector<128xf32>
    %1 = vector.multi_reduction <maximumf>, %0, %cst [1] : vector<128x128xf32> to vector<128xf32>
    %2 = vector.shape_cast %1 : vector<128xf32> to vector<128x1xf32>
    %3 = vector.broadcast %2 : vector<128x1xf32> to vector<128x128xf32>
    %4 = arith.subf %0, %3 : vector<128x128xf32>
    %5 = math.exp %4 : vector<128x128xf32>
    %cst_1 = arith.constant dense<0.000000e+00> : vector<128xf32>
    %6 = vector.multi_reduction <add>, %5, %cst_1 [1] : vector<128x128xf32> to vector<128xf32>
    %7 = vector.shape_cast %6 : vector<128xf32> to vector<128x1xf32>
    %8 = math.log %7 : vector<128x1xf32>
    %9 = arith.addf %2, %8 : vector<128x1xf32>
    %c0_2 = arith.constant 0 : index
    %c0_3 = arith.constant 0 : index
    %10 = vector.load %arg2[%c0_2, %c0_3] : memref<128x1xf32, #tpu.memory_space<vmem>>, vector<128x1xf32>
    tpu.vector_store %arg2[%c0_2, %c0_3], %9 {strides = array<i32>} : memref<128x1xf32, #tpu.memory_space<vmem>>, vector<128x1xf32>,
    return
  }
  func.func @transform_0(%arg0: i32) -> (i32, i32) {
    %c0_i32 = arith.constant 0 : i32
    %c0_i32_0 = arith.constant 0 : i32
    %c0_i32_1 = arith.constant 0 : i32
    return %c0_i32, %c0_i32_0 : i32, i32
  }
  func.func @transform_1(%arg0: i32) -> (i32, i32) {
    %c0_i32 = arith.constant 0 : i32
    %c0_i32_0 = arith.constant 0 : i32
    %c0_i32_1 = arith.constant 0 : i32
    return %c0_i32, %c0_i32_0 : i32, i32
  }
}

</mosaic_0001>

<bundles_post_ra>
// kernel: tpu_custom_call.1
= control target key start
LH: loop header
LB: loop body
LE: loop exit
PB: predicated region body
PF: predicated region fallthrough
CT: control target
= control target key end

     0   :  { %6 = vsyncpa [#allocation3], 0  ;;  %s311_s6 = smov [#allocation2]   ;;  %s488_s0 = inlined_call_operand.hbm [shape: f32[128,128], index: 0, kind: input, shape index: {}]   ;;  %s489_s1 = inlined_call_operand.vmem [shape: f32[128,1], index: 1, kind: output, shape index: {}]  }
   0x1   :  { %s12_s7 = sshll.u32 %s311_s6, 4  ;;  %s287_s10 = scalar_lea.hbm %s488_s0, 2048  ;;  %s13_s7 = int_to_ptr.vmem [resolvable:$true] %s12_s7 }
   0x2   :  { %p288_p0 = scmp.ne.s32.totalorder %s488_s0, %s287_s10  ;;  %p291_p1 = scmp.lt.u32.totalorder %s287_s10, %s488_s0 }
   0x4   :  { %p293_p2 = pnand %p291_p1, %p288_p0 }
   0x6   :  { %296 = shalt.err (!%p293_p2)
}
   0x7   :  { %s297_s15 = scalar_lea.vmem %s13_s7, 2048  ;;  %p302_p4 = scmp.lt.s32.totalorder %s13_s7, %s13_s7 }
   0x8   :  { %p298_p3 = scmp.ne.s32.totalorder %s13_s7, %s297_s15  ;;  %p303_p5 = scmp.lt.s32.totalorder %s297_s15, %s297_s15 }
   0xa   :  { %p304_p6 = por %p303_p5, %p302_p4 }
   0xc   :  { %p305_p7 = pnand %p304_p6, %p298_p3 }
   0xe   :  { %308 = shalt.err (!%p305_p7)
}
   0xf   :  { %s312_s16 = smov 128   ;;  %s313_s17 = smov 8  }
  0x10   :  { %18 = dma.hbm_to_vmem [thread:$0]  %s488_s0, 2048, %s13_s7, [#allocation3], %s312_s16, %s312_s16, %s313_s17  }
  0x11   :  { %309 = dma.done.wait [#allocation3], 2048  }
  0x12   :  { %310 = vsyncadd [#allocation3], 4294965248  ;;  %v22_v0 = vld [vmem:[#allocation2] sm:$0xff]  ;;  %v24_v1 = vld [vmem:[#allocation2 + $0x10] sm:$0xff]  ;;  %vm198_vm0 = vcmask 7168  }
  0x13   :  { %38 = vmax.xlane.f32.xlu0 %v22_v0  ;;  %42 = vmax.xlane.f32.xlu1 %v24_v1  ;;  %v23_v2 = vld [vmem:[#allocation2 + $0x8] sm:$0xff]  ;;  %v25_v3 = vld [vmem:[#allocation2 + $0x18] sm:$0xff]  ;;  %v26_v4 = vld [vmem:[#allocation2 + $0x20] sm:$0xff] }
  0x14   :  { %v27_v5 = vld [vmem:[#allocation2 + $0x28] sm:$0xff]  ;;  %v28_v6 = vld [vmem:[#allocation2 + $0x30] sm:$0xff]  ;;  %v29_v7 = vld [vmem:[#allocation2 + $0x38] sm:$0xff] }
  0x15   :  { %v30_v8 = vld [vmem:[#allocation2 + $0x40] sm:$0xff]  ;;  %v31_v9 = vld [vmem:[#allocation2 + $0x48] sm:$0xff]  ;;  %v336_v10 = vld [vmem:[#allocation2 + $0x50] sm:$0xff] }
  0x16   :  { %v338_v11 = vld [vmem:[#allocation2 + $0x58] sm:$0xff]  ;;  %v342_v12 = vld [vmem:[#allocation2 + $0x60] sm:$0xff]  ;;  %v344_v13 = vld [vmem:[#allocation2 + $0x68] sm:$0xff] }
  0x17   :  { %40 = vmax.xlane.f32.xlu0 %v23_v2  ;;  %44 = vmax.xlane.f32.xlu1 %v25_v3  ;;  %v348_v14 = vld [vmem:[#allocation2 + $0x70] sm:$0xff]  ;;  %v350_v15 = vld [vmem:[#allocation2 + $0x78] sm:$0xff] }
  0x1b   :  { %46 = vmax.xlane.f32.xlu0 %v26_v4  ;;  %48 = vmax.xlane.f32.xlu1 %v27_v5 }
  0x1f   :  { %50 = vmax.xlane.f32.xlu0 %v28_v6  ;;  %52 = vmax.xlane.f32.xlu1 %v29_v7 }
  0x23   :  { %54 = vmax.xlane.f32.xlu0 %v30_v8  ;;  %56 = vmax.xlane.f32.xlu1 %v31_v9 }
  0x27   :  { %58 = vmax.xlane.f32.xlu0 %v336_v10  ;;  %60 = vmax.xlane.f32.xlu1 %v338_v11 }
  0x2b   :  { %62 = vmax.xlane.f32.xlu0 %v342_v12  ;;  %64 = vmax.xlane.f32.xlu1 %v344_v13 }
  0x2f   :  { %66 = vmax.xlane.f32.xlu0 %v348_v14  ;;  %68 = vmax.xlane.f32.xlu1 %v350_v15 }
  0xa0   :  { %v354_v16 = vpop.xlane.xlu0 %38  ;;  %v356_v17 = vpop.xlane.xlu1 %42 }
  0xa1   :  { %v70_v18 = vsub.f32 %v22_v0, %v354_v16  ;;  %v72_v19 = vsub.f32 %v24_v1, %v356_v17 }
  0xa3   :  { %v86_v20 = vmul.f32 1.442695, %v70_v18  ;;  %v90_v21 = vmul.f32 1.442695, %v72_v19 }
  0xa4   :  { %v360_v22 = vpop.xlane.xlu0 %40  ;;  %v362_v23 = vpop.xlane.xlu1 %44 }
  0xa5   :  { %223 = vpow2.f32 %v86_v20  ;;  %v71_v24 = vsub.f32 %v23_v2, %v360_v22  ;;  %v73_v25 = vsub.f32 %v25_v3, %v362_v23 }
  0xa6   :  { %225 = vpow2.f32 %v90_v21 }
  0xa7   :  { %v88_v26 = vmul.f32 1.442695, %v71_v24  ;;  %v92_v27 = vmul.f32 1.442695, %v73_v25 }
  0xa8   :  { %v366_v28 = vpop.xlane.xlu0 %46  ;;  %v368_v29 = vpop.xlane.xlu1 %48 }
  0xa9   :  { %227 = vpow2.f32 %v88_v26  ;;  %v74_v30 = vsub.f32 %v26_v4, %v366_v28  ;;  %v75_v31 = vsub.f32 %v27_v5, %v368_v29 }
  0xaa   :  { %229 = vpow2.f32 %v92_v27 }
  0xab   :  { %v94_v32 = vmul.f32 1.442695, %v74_v30  ;;  %v96_v33 = vmul.f32 1.442695, %v75_v31 }
  0xac   :  { %v372_v34 = vpop.xlane.xlu0 %50  ;;  %v374_v35 = vpop.xlane.xlu1 %52 }
  0xad   :  { %231 = vpow2.f32 %v94_v32  ;;  %v76_v36 = vsub.f32 %v28_v6, %v372_v34  ;;  %v77_v37 = vsub.f32 %v29_v7, %v374_v35 }
  0xae   :  { %233 = vpow2.f32 %v96_v33 }
  0xaf   :  { %v224_v38 = vpop.eup %223  ;;  %v98_v39 = vmul.f32 1.442695, %v76_v36  ;;  %v100_v40 = vmul.f32 1.442695, %v77_v37 }
  0xb0   :  { %118 = vadd.xlane.f32.xlu0 %v224_v38  ;;  %v378_v41 = vpop.xlane.xlu0 %54  ;;  %v380_v42 = vpop.xlane.xlu1 %56 }
  0xb1   :  { %v226_v43 = vpop.eup %225  ;;  %235 = vpow2.f32 %v98_v39  ;;  %v78_v44 = vsub.f32 %v30_v8, %v378_v41  ;;  %v79_v45 = vsub.f32 %v31_v9, %v380_v42 }
  0xb2   :  { %237 = vpow2.f32 %v100_v40 }
  0xb3   :  { %v228_v46 = vpop.eup %227  ;;  %v102_v47 = vmul.f32 1.442695, %v78_v44  ;;  %v104_v48 = vmul.f32 1.442695, %v79_v45 }
  0xb4   :  { %122 = vadd.xlane.f32.xlu0 %v226_v43  ;;  %120 = vadd.xlane.f32.xlu1 %v228_v46  ;;  %v384_v49 = vpop.xlane.xlu0 %58  ;;  %v386_v50 = vpop.xlane.xlu1 %60 }
  0xb5   :  { %v230_v51 = vpop.eup %229  ;;  %239 = vpow2.f32 %v102_v47  ;;  %v80_v52 = vsub.f32 %v336_v10, %v384_v49  ;;  %v81_v53 = vsub.f32 %v338_v11, %v386_v50 }
  0xb6   :  { %241 = vpow2.f32 %v104_v48 }
  0xb7   :  { %v232_v54 = vpop.eup %231  ;;  %v106_v55 = vmul.f32 1.442695, %v80_v52  ;;  %v108_v56 = vmul.f32 1.442695, %v81_v53 }
  0xb8   :  { %124 = vadd.xlane.f32.xlu1 %v230_v51  ;;  %126 = vadd.xlane.f32.xlu0 %v232_v54  ;;  %v392_v57 = vpop.xlane.xlu0 %62  ;;  %v394_v58 = vpop.xlane.xlu1 %64 }
  0xb9   :  { %v234_v59 = vpop.eup %233  ;;  %243 = vpow2.f32 %v106_v55  ;;  %v82_v60 = vsub.f32 %v342_v12, %v392_v57  ;;  %v83_v61 = vsub.f32 %v344_v13, %v394_v58 }
  0xba   :  { %245 = vpow2.f32 %v108_v56 }
  0xbb   :  { %v236_v62 = vpop.eup %235  ;;  %v110_v63 = vmul.f32 1.442695, %v82_v60  ;;  %v112_v0 = vmul.f32 1.442695, %v83_v61 }
  0xbc   :  { %128 = vadd.xlane.f32.xlu1 %v234_v59  ;;  %130 = vadd.xlane.f32.xlu0 %v236_v62  ;;  %v400_v1 = vpop.xlane.xlu0 %66  ;;  %v402_v2 = vpop.xlane.xlu1 %68 }
  0xbd   :  { %v238_v3 = vpop.eup %237  ;;  %247 = vpow2.f32 %v110_v63  ;;  %v84_v4 = vsub.f32 %v348_v14, %v400_v1  ;;  %v85_v5 = vsub.f32 %v350_v15, %v402_v2 }
  0xbe   :  { %249 = vpow2.f32 %v112_v0 }
  0xbf   :  { %v240_v6 = vpop.eup %239  ;;  %v114_v7 = vmul.f32 1.442695, %v84_v4  ;;  %v116_v8 = vmul.f32 1.442695, %v85_v5 }
  0xc0   :  { %132 = vadd.xlane.f32.xlu1 %v238_v3  ;;  %134 = vadd.xlane.f32.xlu0 %v240_v6  ;;  %v242_v9 = vpop.eup %241 }
  0xc1   :  { %251 = vpow2.f32 %v114_v7 }
  0xc2   :  { %253 = vpow2.f32 %v116_v8 }
  0xc3   :  { %v244_v10 = vpop.eup %243 }
  0xc4   :  { %136 = vadd.xlane.f32.xlu1 %v242_v9  ;;  %138 = vadd.xlane.f32.xlu0 %v244_v10  ;;  %v246_v11 = vpop.eup %245 }
  0xc7   :  { %v248_v12 = vpop.eup %247 }
  0xc8   :  { %140 = vadd.xlane.f32.xlu1 %v246_v11  ;;  %142 = vadd.xlane.f32.xlu0 %v248_v12  ;;  %v250_v13 = vpop.eup %249 }
  0xcb   :  { %v252_v14 = vpop.eup %251 }
  0xcc   :  { %144 = vadd.xlane.f32.xlu1 %v250_v13  ;;  %146 = vadd.xlane.f32.xlu0 %v252_v14  ;;  %v254_v15 = vpop.eup %253 }
  0xd0   :  { %148 = vadd.xlane.f32.xlu1 %v254_v15 }
 0x13d   :  { %v119_v18 = vpop.xlane.xlu0 %118 }
 0x13e   :  { %255 = vlog2.f32 %v119_v18 }
 0x141   :  { %v121_v19 = vpop.xlane.xlu1 %120  ;;  %v123_v20 = vpop.xlane.xlu0 %122 }
 0x142   :  { %257 = vlog2.f32 %v121_v19 }
 0x143   :  { %259 = vlog2.f32 %v123_v20 }
 0x145   :  { %v125_v21 = vpop.xlane.xlu1 %124  ;;  %v127_v24 = vpop.xlane.xlu0 %126 }
 0x146   :  { %261 = vlog2.f32 %v125_v21 }
 0x147   :  { %263 = vlog2.f32 %v127_v24 }
 0x148   :  { %v256_v25 = vpop.eup %255 }
 0x149   :  { %v151_v26 = vmul.f32 0.6931472, %v256_v25  ;;  %v129_v27 = vpop.xlane.xlu1 %128  ;;  %v131_v30 = vpop.xlane.xlu0 %130 }
 0x14a   :  { %265 = vlog2.f32 %v129_v27 }
 0x14b   :  { %v182_v31 = vadd.f32 %v151_v26, %v354_v16  ;;  %267 = vlog2.f32 %v131_v30 }
 0x14c   :  { %v258_v32 = vpop.eup %257 }
 0x14d   :  { %v260_v33 = vpop.eup %259  ;;  %199 = vst.msk [vmem:[%s489_s1] sm:$0xff] %vm198_vm0, %v182_v31  ;;  %v153_v36 = vmul.f32 0.6931472, %v258_v32  ;;  %v133_v37 = vpop.xlane.xlu1 %132 }
 0x14e   :  { %v135_v38 = vpop.xlane.xlu0 %134  ;;  %v155_v39 = vmul.f32 0.6931472, %v260_v33  ;;  %269 = vlog2.f32 %v133_v37 }
 0x14f   :  { %v183_v40 = vadd.f32 %v153_v36, %v360_v22  ;;  %271 = vlog2.f32 %v135_v38 }
 0x150   :  { %v262_v43 = vpop.eup %261  ;;  %v184_v44 = vadd.f32 %v155_v39, %v356_v17 }
 0x151   :  { %v264_v16 = vpop.eup %263  ;;  %200 = vst.msk [vmem:[%s489_s1 + $0x8] sm:$0xff] %vm198_vm0, %v183_v40  ;;  %v157_v45 = vmul.f32 0.6931472, %v262_v43  ;;  %v137_v46 = vpop.xlane.xlu1 %136 }
 0x152   :  { %v139_v47 = vpop.xlane.xlu0 %138  ;;  %201 = vst.msk [vmem:[%s489_s1 + $0x10] sm:$0xff] %vm198_vm0, %v184_v44  ;;  %v159_v48 = vmul.f32 0.6931472, %v264_v16  ;;  %273 = vlog2.f32 %v137_v46 }
 0x153   :  { %v185_v22 = vadd.f32 %v157_v45, %v362_v23  ;;  %275 = vlog2.f32 %v139_v47 }
 0x154   :  { %v266_v17 = vpop.eup %265  ;;  %v186_v51 = vadd.f32 %v159_v48, %v366_v28 }
 0x155   :  { %v268_v52 = vpop.eup %267  ;;  %202 = vst.msk [vmem:[%s489_s1 + $0x18] sm:$0xff] %vm198_vm0, %v185_v22  ;;  %v161_v53 = vmul.f32 0.6931472, %v266_v17  ;;  %v141_v54 = vpop.xlane.xlu1 %140 }
 0x156   :  { %v143_v55 = vpop.xlane.xlu0 %142  ;;  %203 = vst.msk [vmem:[%s489_s1 + $0x20] sm:$0xff] %vm198_vm0, %v186_v51  ;;  %v163_v56 = vmul.f32 0.6931472, %v268_v52  ;;  %277 = vlog2.f32 %v141_v54 }
 0x157   :  { %v187_v23 = vadd.f32 %v161_v53, %v368_v29  ;;  %279 = vlog2.f32 %v143_v55 }
 0x158   :  { %v270_v28 = vpop.eup %269  ;;  %v188_v59 = vadd.f32 %v163_v56, %v372_v34 }
 0x159   :  { %v272_v60 = vpop.eup %271  ;;  %204 = vst.msk [vmem:[%s489_s1 + $0x28] sm:$0xff] %vm198_vm0, %v187_v23  ;;  %v165_v61 = vmul.f32 0.6931472, %v270_v28  ;;  %v145_v62 = vpop.xlane.xlu1 %144 }
 0x15a   :  { %v147_v63 = vpop.xlane.xlu0 %146  ;;  %205 = vst.msk [vmem:[%s489_s1 + $0x30] sm:$0xff] %vm198_vm0, %v188_v59  ;;  %v167_v0 = vmul.f32 0.6931472, %v272_v60  ;;  %281 = vlog2.f32 %v145_v62 }
 0x15b   :  { %v189_v29 = vadd.f32 %v165_v61, %v374_v35  ;;  %283 = vlog2.f32 %v147_v63 }
 0x15c   :  { %v274_v34 = vpop.eup %273  ;;  %v190_v3 = vadd.f32 %v167_v0, %v378_v41 }
 0x15d   :  { %v276_v4 = vpop.eup %275  ;;  %206 = vst.msk [vmem:[%s489_s1 + $0x38] sm:$0xff] %vm198_vm0, %v189_v29  ;;  %v169_v5 = vmul.f32 0.6931472, %v274_v34  ;;  %v149_v6 = vpop.xlane.xlu1 %148 }
 0x15e   :  { %207 = vst.msk [vmem:[%s489_s1 + $0x40] sm:$0xff] %vm198_vm0, %v190_v3  ;;  %v171_v7 = vmul.f32 0.6931472, %v276_v4  ;;  %285 = vlog2.f32 %v149_v6 }
 0x15f   :  { %v191_v35 = vadd.f32 %v169_v5, %v380_v42 }
 0x160   :  { %v278_v8 = vpop.eup %277  ;;  %v192_v41 = vadd.f32 %v171_v7, %v384_v49 }
 0x161   :  { %v280_v9 = vpop.eup %279  ;;  %208 = vst.msk [vmem:[%s489_s1 + $0x48] sm:$0xff] %vm198_vm0, %v191_v35  ;;  %v173_v10 = vmul.f32 0.6931472, %v278_v8 }
 0x162   :  { %209 = vst.msk [vmem:[%s489_s1 + $0x50] sm:$0xff] %vm198_vm0, %v192_v41  ;;  %v175_v11 = vmul.f32 0.6931472, %v280_v9 }
 0x163   :  { %v193_v12 = vadd.f32 %v173_v10, %v386_v50 }
 0x164   :  { %v282_v13 = vpop.eup %281  ;;  %v194_v42 = vadd.f32 %v175_v11, %v392_v57 }
 0x165   :  { %v284_v14 = vpop.eup %283  ;;  %210 = vst.msk [vmem:[%s489_s1 + $0x58] sm:$0xff] %vm198_vm0, %v193_v12  ;;  %v177_v49 = vmul.f32 0.6931472, %v282_v13 }
 0x166   :  { %211 = vst.msk [vmem:[%s489_s1 + $0x60] sm:$0xff] %vm198_vm0, %v194_v42  ;;  %v179_v15 = vmul.f32 0.6931472, %v284_v14 }
 0x167   :  { %v195_v18 = vadd.f32 %v177_v49, %v394_v58 }
 0x168   :  { %v286_v19 = vpop.eup %285  ;;  %v196_v50 = vadd.f32 %v179_v15, %v400_v1 }
 0x169   :  { %212 = vst.msk [vmem:[%s489_s1 + $0x68] sm:$0xff] %vm198_vm0, %v195_v18  ;;  %v181_v57 = vmul.f32 0.6931472, %v286_v19 }
 0x16a   :  { %213 = vst.msk [vmem:[%s489_s1 + $0x70] sm:$0xff] %vm198_vm0, %v196_v50 }
 0x16b   :  { %v197_v20 = vadd.f32 %v181_v57, %v402_v2 }
 0x16d   :  { %214 = vst.msk [vmem:[%s489_s1 + $0x78] sm:$0xff] %vm198_vm0, %v197_v20 }
 0x16e   :  { %219 = vsyncpa [#allocation3], 1 }

</bundles_post_ra>
